<compile_context>
chip_gen: v7x
topology: tpu7x:2x2x1
jax: 0.10.0
libtpu: 0.0.40
codegen_flags: <defaults>
</compile_context>

<pallas_src>
import jax
import jax.numpy as jnp
from jax.experimental import pallas as pl
from jax.experimental.pallas import tpu as pltpu

_EPS_F32 = float(jnp.finfo(jnp.float32).eps)  # == np.finfo(np.float32).eps

_TARGET_BLOCK_BYTES = 2 * 1024 * 1024   # ~2 MiB block -> ~8 MiB double-buffered in+out
_MAX_BLOCK_BYTES = 3 * 1024 * 1024      # hard cap so we never blow default scoped VMEM
_MIN_PALLAS_BYTES = 1 * 1024 * 1024     # below this, fused XLA beats kernel launch cost


def _spacenorm_kernel(x_ref, o_ref):
    # x_ref / o_ref view: (tm, H*W).  Each row is one (n, c) spatial slice,
    # so a per-row sum is equivalent to sum(-1).sum(-2) in NCHW.
    hw = x_ref.shape[-1]
    # denom = sum(x + eps) computed as sum(x) + hw*eps: avoids materializing a
    # full (tm, hw) x+eps temporary that Mosaic would spill to VMEM.
    denom = (
        jnp.sum(x_ref[...].astype(jnp.float32), axis=-1, keepdims=True)
        + hw * _EPS_F32
    )                                                       # (tm, 1)
    inv = pl.reciprocal(denom, approx=False)                # exact; keeps 1e-6 tol
    # Re-read x_ref from VMEM (vld bandwidth easily absorbs the second read).
    o_ref[...] = (
        (x_ref[...].astype(jnp.float32) + _EPS_F32) * inv
    ).astype(o_ref.dtype)


def _reference(x):
    x = x + _EPS_F32
    return x / jnp.sum(x, axis=(-2, -1), keepdims=True)


def _pick_tm(rows, hw, itemsize):
    """Row-tile size: ~2 MiB blocks, sublane/packing aligned, >=2 grid steps when legal."""
    # Sub-32-bit dtypes pack rows along sublanes: 8 for f32, 16 for bf16, 32 for int8/fp8.
    sub = max(8, 32 // max(1, itemsize))
    bytes_per_row = hw * itemsize

    target_rows = _TARGET_BLOCK_BYTES // max(1, bytes_per_row)
    tm = max(sub, (target_rows // sub) * sub)

    if tm >= rows:
        # Whole problem fits in one block.  If we can legally split into two
        # sublane-aligned blocks, do so, so v7x's two TensorCores both get a
        # grid step (no effect on v5e/v6e).
        if rows >= 2 * sub:
            tm = max(sub, ((rows // 2) // sub) * sub)
        else:
            tm = rows  # full extent: always a legal block dim
    return tm, sub, bytes_per_row


def space_normalization(x, *, force_pallas=False):
    """x: float array of shape (N, C, H, W) -> same shape; each (n, c) slice sums to 1."""
    N, C, H, W = x.shape
    rows = N * C
    hw = H * W
    itemsize = x.dtype.itemsize
    total_bytes = rows * hw * itemsize

    # Tiny inputs: pallas_call launch + pipeline prologue dominates; plain jnp wins.
    if total_bytes < _MIN_PALLAS_BYTES and not force_pallas:
        return _reference(x)

    tm, sub, bytes_per_row = _pick_tm(rows, hw, itemsize)

    # Pathologically large H*W: even a minimum-height block would exceed the
    # per-block VMEM budget (double-buffered in+out).  Fall back to jnp.
    # TODO(synk): add a second ("arbitrary") reduction grid axis over hw with
    # pl.when init/finalize to cover this regime in-kernel.
    if tm * bytes_per_row > _MAX_BLOCK_BYTES and tm > min(rows, sub):
        tm = min(rows, sub)
    if tm * bytes_per_row > _MAX_BLOCK_BYTES:
        return _reference(x)

    # Lane-dense layout: last dim = H*W.
    x2 = x.reshape(rows, hw)

    # Ragged last block (rows % tm != 0) is safe: rows are independent and
    # out-of-bounds writes of the padded block are masked.
    grid = (pl.cdiv(rows, tm),)

    out2 = pl.pallas_call(
        _spacenorm_kernel,
        out_shape=jax.ShapeDtypeStruct((rows, hw), x.dtype),
        grid=grid,
        in_specs=[pl.BlockSpec((tm, hw), lambda i: (i, 0))],
        out_specs=pl.BlockSpec((tm, hw), lambda i: (i, 0)),
        compiler_params=pltpu.CompilerParams(
            dimension_semantics=("parallel",)
        ),
    )(x2)

    return out2.reshape(N, C, H, W)


if __name__ == "__main__":
    key = jax.random.PRNGKey(0)
    x = jax.random.uniform(key, (2, 4, 16, 16), dtype=jnp.float32)

    # Force the Pallas path even though this test shape is tiny.
    out = space_normalization(x, force_pallas=True)
    out = jax.block_until_ready(out)

    ref = _reference(x)
    assert out.shape == x.shape
    assert jnp.allclose(out, ref, atol=1e-6, rtol=1e-6), "mismatch vs reference"
    # each spatial slice should sum to ~1
    assert jnp.allclose(jnp.sum(out, axis=(-2, -1)), 1.0, atol=1e-5)

    print("KERNEL_OK")
</pallas_src>

<mosaic_0001>
module attributes {stable_mosaic.version = 11 : i64} {
  func.func @_spacenorm_kernel(%arg0: i32, %arg1: memref<8x256xf32, #tpu.memory_space<vmem>>, %arg2: memref<8x256xf32, #tpu.memory_space<vmem>>) attributes {dimension_semantics = [#tpu.dimension_semantics<parallel>], iteration_bounds = array<i64: 1>, scalar_prefetch = 0 : i64, scratch_operands = 0 : i64, tpu.core_type = #tpu.core_type<tc>, window_params = [{transform_indices = @transform_0, window_bounds = array<i64: 8, 256>}, {transform_indices = @transform_1, window_bounds = array<i64: 8, 256>}]} {
    %c0 = arith.constant 0 : index
    %c0_0 = arith.constant 0 : index
    %0 = vector.load %arg1[%c0, %c0_0] : memref<8x256xf32, #tpu.memory_space<vmem>>, vector<8x256xf32>
    %cst = arith.constant dense<0.000000e+00> : vector<8xf32>
    %1 = vector.multi_reduction <add>, %0, %cst [1] : vector<8x256xf32> to vector<8xf32>
    %2 = vector.shape_cast %1 : vector<8xf32> to vector<8x1xf32>
    %cst_1 = arith.constant 3.05175781E-5 : f32
    %3 = vector.broadcast %cst_1 : f32 to vector<8x1xf32>
    %4 = arith.addf %2, %3 : vector<8x1xf32>
    %5 = tpu.reciprocal %4 : vector<8x1xf32> -> vector<8x1xf32>
    %c0_2 = arith.constant 0 : index
    %c0_3 = arith.constant 0 : index
    %6 = vector.load %arg1[%c0_2, %c0_3] : memref<8x256xf32, #tpu.memory_space<vmem>>, vector<8x256xf32>
    %cst_4 = arith.constant 1.1920929E-7 : f32
    %7 = vector.broadcast %cst_4 : f32 to vector<8x256xf32>
    %8 = arith.addf %6, %7 : vector<8x256xf32>
    %9 = vector.broadcast %5 : vector<8x1xf32> to vector<8x256xf32>
    %10 = arith.mulf %8, %9 : vector<8x256xf32>
    %c0_5 = arith.constant 0 : index
    %c0_6 = arith.constant 0 : index
    %11 = vector.load %arg2[%c0_5, %c0_6] : memref<8x256xf32, #tpu.memory_space<vmem>>, vector<8x256xf32>
    tpu.vector_store %arg2[%c0_5, %c0_6], %10 {strides = array<i32>} : memref<8x256xf32, #tpu.memory_space<vmem>>, vector<8x256xf32>,
    return
  }
  func.func @transform_0(%arg0: i32) -> (i32, i32) {
    %c0_i32 = arith.constant 0 : i32
    %c0_i32_0 = arith.constant 0 : i32
    return %arg0, %c0_i32 : i32, i32
  }
  func.func @transform_1(%arg0: i32) -> (i32, i32) {
    %c0_i32 = arith.constant 0 : i32
    %c0_i32_0 = arith.constant 0 : i32
    return %arg0, %c0_i32 : i32, i32
  }
}

</mosaic_0001>

<bundles_post_ra>
// kernel: tpu_custom_call.1
= control target key start
LH: loop header
LB: loop body
LE: loop exit
PB: predicated region body
PF: predicated region fallthrough
CT: control target
= control target key end

     0   :  { %6 = vsyncpa [#allocation3], 0  ;;  %s137_s0 = inlined_call_operand.hbm [shape: f32[8,256], index: 0, kind: input, shape index: {}]   ;;  %s138_s1 = inlined_call_operand.hbm [shape: f32[8,256], index: 1, kind: output, shape index: {}]  }
   0x1   :  { %7 = vsyncpa [#allocation4], 0  ;;  %s101_s6 = smov [#allocation2]   ;;  %s53_s10 = scalar_lea.hbm %s137_s0, 256 }
   0x2   :  { %s14_s7 = sshll.u32 %s101_s6, 4  ;;  %p54_p0 = scmp.ne.s32.totalorder %s137_s0, %s53_s10  ;;  %s15_s7 = int_to_ptr.vmem [resolvable:$true] %s14_s7 }
   0x3   :  { %p57_p1 = scmp.lt.u32.totalorder %s53_s10, %s137_s0 }
   0x5   :  { %p59_p2 = pnand %p57_p1, %p54_p0 }
   0x7   :  { %62 = shalt.err (!%p59_p2)
}
   0x8   :  { %s63_s15 = scalar_lea.vmem %s15_s7, 256  ;;  %p68_p4 = scmp.lt.s32.totalorder %s15_s7, %s15_s7 }
   0x9   :  { %p64_p3 = scmp.ne.s32.totalorder %s15_s7, %s63_s15  ;;  %p69_p5 = scmp.lt.s32.totalorder %s63_s15, %s63_s15 }
   0xb   :  { %p70_p6 = por %p69_p5, %p68_p4 }
   0xd   :  { %p71_p7 = pnand %p70_p6, %p64_p3 }
   0xf   :  { %74 = shalt.err (!%p71_p7)
}
  0x10   :  { %17 = dma.hbm_to_vmem [thread:$0]  %s137_s0, 256, %s15_s7, [#allocation3]  }
  0x11   :  { %97 = dma.done.wait [#allocation3], 256  }
  0x12   :  { %98 = vsyncadd [#allocation3], 4294967040  ;;  %v21_v0 = vld [vmem:[#allocation2] sm:$0xff]  ;;  %v22_v1 = vld [vmem:[#allocation2 + $0x8] sm:$0xff]  ;;  %s102_s18 = smov [#allocation5]  }
  0x13   :  { %v23_v2 = vadd.f32 %v22_v1, %v21_v0  ;;  %v28_v5 = vadd.f32 1.1920929e-07, %v21_v0  ;;  %v29_v6 = vadd.f32 1.1920929e-07, %v22_v1  ;;  %s40_s19 = sshll.u32 %s102_s18, 4  ;;  %s41_s19 = int_to_ptr.vmem [resolvable:$true] %s40_s19 }
  0x14   :  { %s75_s0 = scalar_lea.vmem %s41_s19, 256  ;;  %p80_p9 = scmp.lt.s32.totalorder %s41_s19, %s41_s19 }
  0x15   :  { %24 = vadd.xlane.f32.xlu0 %v23_v2  ;;  %p76_p8 = scmp.ne.s32.totalorder %s41_s19, %s75_s0  ;;  %p81_p10 = scmp.lt.s32.totalorder %s75_s0, %s75_s0 }
  0x17   :  { %p82_p11 = por %p81_p10, %p80_p9 }
  0x19   :  { %p83_p12 = pnand %p82_p11, %p76_p8 }
  0xa2   :  { %v25_v3 = vpop.xlane.xlu0 %24 }
  0xa3   :  { %v26_v4 = vadd.f32 3.0517578e-05, %v25_v3 }
  0xa5   :  { %51 = vrcp.f32 %v26_v4 }
  0xaf   :  { %v52_v7 = vpop.eup %51 }
  0xb0   :  { %v30_v8 = vmul.f32 %v52_v7, %v28_v5  ;;  %v31_v9 = vmul.f32 %v52_v7, %v29_v6 }
  0xb2   :  { %32 = vst [vmem:[#allocation5] sm:$0xff] %v30_v8  ;;  %33 = vst [vmem:[#allocation5 + $0x8] sm:$0xff] %v31_v9 }
  0xb3   :  { %86 = shalt.err (!%p83_p12)
}
  0xb4   :  { %s87_s22 = scalar_lea.hbm %s138_s1, 256 }
  0xb5   :  { %p88_p13 = scmp.ne.s32.totalorder %s138_s1, %s87_s22  ;;  %p91_p0 = scmp.lt.u32.totalorder %s87_s22, %s138_s1 }
  0xb7   :  { %p93_p1 = pnand %p91_p0, %p88_p13 }
  0xb9   :  { %96 = shalt.err (!%p93_p1)
}
  0xba   :  { %43 = dma.vmem_to_hbm [thread:$0]  %s41_s19, 256, %s138_s1, [#allocation4]  }
  0xbb   :  { %99 = dma.done.wait [#allocation4], 256  }
  0xbc   :  { %100 = vsyncadd [#allocation4], 4294967040 }
  0xbd   :  { %47 = vsyncpa [#allocation3], 1 }
  0xbe   :  { %48 = vsyncpa [#allocation4], 1 }

</bundles_post_ra>
